<compile_context>
chip_gen: v7x
topology: tpu7x:2x2x1
jax: 0.10.0
libtpu: 0.0.40
codegen_flags: <defaults>
</compile_context>

<pallas_src>
import functools

import jax
import jax.numpy as jnp
from jax.experimental import pallas as pl
from jax.experimental.pallas import tpu as pltpu


def layernorm2d_kernel(x_ref, w_ref, b_ref, o_ref, *, eps):
    # x_ref: (1, C, T) block; normalize across axis 1 (channels).
    x = x_ref[...].astype(jnp.float32)
    u = jnp.mean(x, axis=1, keepdims=True)           # (1, 1, T)
    d = x - u
    s = jnp.mean(d * d, axis=1, keepdims=True)       # (1, 1, T)
    inv = jax.lax.rsqrt(s + eps)                     # EUP rsqrt, f32
    o_ref[...] = (d * inv * w_ref[...] + b_ref[...]).astype(o_ref.dtype)


def _cdiv(a, b):
    return -(-a // b)


def _round_down_128(n):
    return max(128, (n // 128) * 128)


def _default_tile_bytes():
    """~2 MiB of x per step on v5e/v6e, ~4 MiB on v7x (faster HBM)."""
    try:
        kind = jax.devices()[0].device_kind.lower()
    except Exception:
        kind = ""
    return (4 << 20) if "v7" in kind else (2 << 20)


def _vmem_need_bytes(C, lanes, itemsize):
    """Estimated VMEM footprint for one grid step."""
    io = 2 * 2 * C * lanes * itemsize        # double-buffered x in + out tiles
    tmp = 3 * C * lanes * 4                  # f32 in-kernel temporaries (x, d, result)
    params = 2 * 2 * C * 4                   # weight/bias (double-buffered, tiny)
    return io + tmp + params


def _choose_tiling(B, C, HW, itemsize, tile_bytes, vmem_cap=28 << 20):
    """Pick a lane-dense spatial tile and the padded spatial extent."""
    hw128 = _cdiv(HW, 128) * 128
    lanes = _round_down_128(tile_bytes // max(C * itemsize, 1))
    lanes = min(lanes, hw128)
    # Shrink until the estimated VMEM footprint fits comfortably under the
    # v7x scoped default (32 MiB) with headroom for compiler scratch.
    while lanes > 128 and _vmem_need_bytes(C, lanes, itemsize) > vmem_cap:
        lanes = _round_down_128(lanes // 2)
    # Keep >= 2 total grid steps whenever possible so both v7x TensorCores
    # get work under dimension_semantics=("parallel", "parallel").
    if B * _cdiv(hw128, lanes) < 2 and hw128 > 128:
        lanes = _round_down_128(hw128 // 2)
    hw_pad = _cdiv(hw128, lanes) * lanes
    return lanes, hw_pad


@functools.partial(jax.jit, static_argnames=("eps", "tile_bytes"))
def layernorm2d_forward(x, weight, bias, eps=1e-6, tile_bytes=None):
    """x: (B, C, H, W); weight/bias: (C,). Matches PyTorch LayerNorm2d."""
    B, C, H, W = x.shape
    HW = H * W
    itemsize = jnp.dtype(x.dtype).itemsize
    if tile_bytes is None:
        tile_bytes = _default_tile_bytes()

    t_hw, HW_pad = _choose_tiling(B, C, HW, itemsize, tile_bytes)

    x3 = x.reshape(B, C, HW)
    if HW_pad != HW:
        # Zero padding: padded pixels see mean 0 / var 0 -> rsqrt(eps) is
        # finite; their outputs are sliced off below.
        x3 = jnp.pad(x3, ((0, 0), (0, 0), (0, HW_pad - HW)))
    # Params pre-cast to f32 (compute dtype) so no per-step cast in-kernel.
    w3 = weight.astype(jnp.float32).reshape(1, C, 1)
    b3 = bias.astype(jnp.float32).reshape(1, C, 1)

    grid = (B, HW_pad // t_hw)

    # VMEM limit sized from the real footprint (not a flat 48 MiB), capped at
    # 32 MiB so it is safe on v7x (64 MiB physical) and generous on v5e/v6e.
    vmem_limit = int(min(max(_vmem_need_bytes(C, t_hw, itemsize) * 3 // 2,
                             4 << 20), 32 << 20))

    # Advisory cost estimate so XLA schedules neighbors around the call sanely.
    cost = pl.CostEstimate(
        flops=7 * B * C * HW_pad,                      # mean/var/normalize/affine
        transcendentals=B * HW_pad,                    # one rsqrt per pixel
        bytes_accessed=2 * B * C * HW_pad * itemsize + (w3.size + b3.size) * 4,
    )

    out3 = pl.pallas_call(
        functools.partial(layernorm2d_kernel, eps=eps),
        out_shape=jax.ShapeDtypeStruct((B, C, HW_pad), x.dtype),
        grid_spec=pltpu.PrefetchScalarGridSpec(
            num_scalar_prefetch=0,
            grid=grid,
            in_specs=[
                pl.BlockSpec((1, C, t_hw), lambda i, j: (i, 0, j)),   # x tile
                pl.BlockSpec((1, C, 1), lambda i, j: (0, 0, 0)),      # weight
                pl.BlockSpec((1, C, 1), lambda i, j: (0, 0, 0)),      # bias
            ],
            out_specs=pl.BlockSpec((1, C, t_hw), lambda i, j: (i, 0, j)),
        ),
        compiler_params=pltpu.CompilerParams(
            dimension_semantics=("parallel", "parallel"),
            vmem_limit_bytes=vmem_limit,
        ),
        cost_estimate=cost,
    )(x3, w3, b3)

    if HW_pad != HW:
        out3 = out3[:, :, :HW]
    return out3.reshape(B, C, H, W)


def reference_layernorm2d(x, weight, bias, eps=1e-6):
    u = jnp.mean(x, axis=1, keepdims=True)
    s = jnp.mean((x - u) ** 2, axis=1, keepdims=True)
    xn = (x - u) / jnp.sqrt(s + eps)
    return weight[None, :, None, None] * xn + bias[None, :, None, None]


if __name__ == "__main__":
    key = jax.random.PRNGKey(0)
    kx, kw, kb, kx2 = jax.random.split(key, 4)

    # Small shapes consistent with the module: NCHW with per-channel affine.
    B, C, H, W = 2, 4, 16, 16
    x = jax.random.normal(kx, (B, C, H, W), dtype=jnp.float32)
    # Non-trivial affine parameters so the weight/bias path is actually tested.
    weight = 1.0 + 0.1 * jax.random.normal(kw, (C,), dtype=jnp.float32)
    bias = 0.1 * jax.random.normal(kb, (C,), dtype=jnp.float32)

    out = jax.block_until_ready(layernorm2d_forward(x, weight, bias))
    ref = reference_layernorm2d(x, weight, bias)
    assert out.shape == (B, C, H, W)
    assert jnp.allclose(out, ref, atol=1e-5, rtol=1e-5), "mismatch vs reference"

    # Non-128-aligned spatial extent: exercises the pad-and-slice path
    # (lane-dense stores, bounded VMEM blocks).
    H2, W2 = 10, 10
    x2 = jax.random.normal(kx2, (B, C, H2, W2), dtype=jnp.float32)
    out2 = jax.block_until_ready(layernorm2d_forward(x2, weight, bias))
    ref2 = reference_layernorm2d(x2, weight, bias)
    assert out2.shape == (B, C, H2, W2)
    assert jnp.allclose(out2, ref2, atol=1e-5, rtol=1e-5), "mismatch (padded path)"

    print("KERNEL_OK")
</pallas_src>

<mosaic_0001>
module attributes {stable_mosaic.version = 11 : i64} {
  func.func @layernorm2d_kernel(%arg0: i32, %arg1: i32, %arg2: memref<1x4x256xf32, #tpu.memory_space<vmem>>, %arg3: memref<1x4x1xf32, #tpu.memory_space<vmem>>, %arg4: memref<1x4x1xf32, #tpu.memory_space<vmem>>, %arg5: memref<1x4x256xf32, #tpu.memory_space<vmem>>) attributes {dimension_semantics = [#tpu.dimension_semantics<parallel>, #tpu.dimension_semantics<parallel>], iteration_bounds = array<i64: 2, 1>, scalar_prefetch = 0 : i64, scratch_operands = 0 : i64, tpu.core_type = #tpu.core_type<tc>, window_params = [{transform_indices = @transform_0, window_bounds = array<i64: 1, 4, 256>}, {pipeline_mode = #tpu.pipeline_mode<synchronous>, transform_indices = @transform_1, window_bounds = array<i64: 1, 4, 1>}, {pipeline_mode = #tpu.pipeline_mode<synchronous>, transform_indices = @transform_2, window_bounds = array<i64: 1, 4, 1>}, {transform_indices = @transform_3, window_bounds = array<i64: 1, 4, 256>}]} {
    %c0 = arith.constant 0 : index
    %c0_0 = arith.constant 0 : index
    %c0_1 = arith.constant 0 : index
    %0 = vector.load %arg2[%c0, %c0_0, %c0_1] : memref<1x4x256xf32, #tpu.memory_space<vmem>>, vector<1x4x256xf32>
    %cst = arith.constant dense<0.000000e+00> : vector<1x256xf32>
    %1 = vector.multi_reduction <add>, %0, %cst [1] : vector<1x4x256xf32> to vector<1x256xf32>
    %2 = vector.shape_cast %1 : vector<1x256xf32> to vector<1x1x256xf32>
    %cst_2 = arith.constant 4.000000e+00 : f32
    %3 = vector.broadcast %cst_2 : f32 to vector<1x1x256xf32>
    %4 = arith.divf %2, %3 : vector<1x1x256xf32>
    %5 = vector.broadcast %4 : vector<1x1x256xf32> to vector<1x4x256xf32>
    %6 = arith.subf %0, %5 : vector<1x4x256xf32>
    %7 = arith.mulf %6, %6 : vector<1x4x256xf32>
    %cst_3 = arith.constant dense<0.000000e+00> : vector<1x256xf32>
    %8 = vector.multi_reduction <add>, %7, %cst_3 [1] : vector<1x4x256xf32> to vector<1x256xf32>
    %9 = vector.shape_cast %8 : vector<1x256xf32> to vector<1x1x256xf32>
    %cst_4 = arith.constant 4.000000e+00 : f32
    %10 = vector.broadcast %cst_4 : f32 to vector<1x1x256xf32>
    %11 = arith.divf %9, %10 : vector<1x1x256xf32>
    %cst_5 = arith.constant 9.99999997E-7 : f32
    %12 = vector.broadcast %cst_5 : f32 to vector<1x1x256xf32>
    %13 = arith.addf %11, %12 : vector<1x1x256xf32>
    %14 = math.rsqrt %13 : vector<1x1x256xf32>
    %15 = vector.broadcast %14 : vector<1x1x256xf32> to vector<1x4x256xf32>
    %16 = arith.mulf %6, %15 : vector<1x4x256xf32>
    %c0_6 = arith.constant 0 : index
    %c0_7 = arith.constant 0 : index
    %c0_8 = arith.constant 0 : index
    %17 = vector.load %arg3[%c0_6, %c0_7, %c0_8] : memref<1x4x1xf32, #tpu.memory_space<vmem>>, vector<1x4x1xf32>
    %18 = vector.broadcast %17 : vector<1x4x1xf32> to vector<1x4x256xf32>
    %19 = arith.mulf %16, %18 : vector<1x4x256xf32>
    %c0_9 = arith.constant 0 : index
    %c0_10 = arith.constant 0 : index
    %c0_11 = arith.constant 0 : index
    %20 = vector.load %arg4[%c0_9, %c0_10, %c0_11] : memref<1x4x1xf32, #tpu.memory_space<vmem>>, vector<1x4x1xf32>
    %21 = vector.broadcast %20 : vector<1x4x1xf32> to vector<1x4x256xf32>
    %22 = arith.addf %19, %21 : vector<1x4x256xf32>
    %c0_12 = arith.constant 0 : index
    %c0_13 = arith.constant 0 : index
    %c0_14 = arith.constant 0 : index
    %23 = vector.load %arg5[%c0_12, %c0_13, %c0_14] : memref<1x4x256xf32, #tpu.memory_space<vmem>>, vector<1x4x256xf32>
    tpu.vector_store %arg5[%c0_12, %c0_13, %c0_14], %22 {strides = array<i32>} : memref<1x4x256xf32, #tpu.memory_space<vmem>>, vector<1x4x256xf32>,
    return
  }
  func.func @transform_0(%arg0: i32, %arg1: i32) -> (i32, i32, i32) {
    %c0_i32 = arith.constant 0 : i32
    %c0_i32_0 = arith.constant 0 : i32
    return %arg0, %c0_i32, %arg1 : i32, i32, i32
  }
  func.func @transform_1(%arg0: i32, %arg1: i32) -> (i32, i32, i32) {
    %c0_i32 = arith.constant 0 : i32
    %c0_i32_0 = arith.constant 0 : i32
    %c0_i32_1 = arith.constant 0 : i32
    %c0_i32_2 = arith.constant 0 : i32
    return %c0_i32, %c0_i32_0, %c0_i32_1 : i32, i32, i32
  }
  func.func @transform_2(%arg0: i32, %arg1: i32) -> (i32, i32, i32) {
    %c0_i32 = arith.constant 0 : i32
    %c0_i32_0 = arith.constant 0 : i32
    %c0_i32_1 = arith.constant 0 : i32
    %c0_i32_2 = arith.constant 0 : i32
    return %c0_i32, %c0_i32_0, %c0_i32_1 : i32, i32, i32
  }
  func.func @transform_3(%arg0: i32, %arg1: i32) -> (i32, i32, i32) {
    %c0_i32 = arith.constant 0 : i32
    %c0_i32_0 = arith.constant 0 : i32
    return %arg0, %c0_i32, %arg1 : i32, i32, i32
  }
}

</mosaic_0001>

<bundles_post_ra>
// kernel: layernorm2d_forward.1
= control target key start
LH: loop header
LB: loop body
LE: loop exit
PB: predicated region body
PF: predicated region fallthrough
CT: control target
= control target key end

     0   :  { %s473_s12 = smov 0   ;;  %s475_s13 = smov 0   ;;  %s523_s0 = inlined_call_operand.vmem [shape: f32[2,4,256], index: 0, kind: input, shape index: {}]   ;;  %s524_s1 = inlined_call_operand.vmem [shape: f32[1,4,1], index: 1, kind: input, shape index: {}]   ;;  %s525_s2 = inlined_call_operand.vmem [shape: f32[1,4,1], index: 2, kind: input, shape index: {}]   ;;  %s526_s3 = inlined_call_operand.vmem [shape: f32[2,4,256], index: 3, kind: output, shape index: {}]  }
   0x1   :  { %s477_s14 = smov 0  }
   0x2 LB: > { %s25_s15 = sadd.s32 1, %s445_s13  ;;  %p386_p0 = scmp.ge.s32.totalorder %s449_s14, 1  ;;  %s449_s14 = sphi %s477_s14, %s13_s14   ;;  %s445_s13 = sphi %s475_s13, %s528_s13   ;;  %s441_s12 = sphi %s473_s12, %s527_s12  }
   0x3   : > { %p27_p1 = scmp.ge.s32.totalorder %s25_s15, 2  ;;  %p158_p2 = scmp.lt.s32.totalorder %s449_s14, 3 }
   0x5   : > { %s530_s15 = smov (%p27_p1, %s25_s15), 0  ;;  %p159_p3 = pnand %p386_p0, %p158_p2 }
   0x6   : > { %v266_v0 = vld [vmem:[%s524_s1] sm:$0xf] (!%p159_p3)  ;;  %v451_v1 = vmov (!%p159_p3), 0   ;;  %p191_p4 = scmp.lt.s32.totalorder (!%p159_p3), %s441_s12, 1  ;;  %vm214_vm0 = vcmask (!%p159_p3), 1043456   ;;  %v274_v45 = vlaneseq (!%p159_p3) }
   0x7   : > { %162 = sbr.rel (%p159_p3) target bundleno = 145 (0x91), region = 32  ;;  %421 = vset.pattern.permute.xlu0 (!%p159_p3), %v451_v1  ;;  %v280_v2 = vld [vmem:[%s525_s2] sm:$0xf] (!%p159_p3)  ;;  %v452_v43 = vmov (!%p159_p3), 839922192  }
   0x8   : > { %269 = vperm.xlu0 (!%p159_p3), %421, %v266_v0   ;;  %v272_v44 = vunpack.c.l.s4 (!%p159_p3), %v452_v43  ;;  %v275_v48 = vshrl.u32 (!%p159_p3), %v274_v45, 7 }
   0xa   : > { %v273_v47 = vunpack.c.0.s8 (!%p159_p3), %v272_v44 }
   0xc   : > { %283 = vperm.xlu0 (!%p159_p3), %421, %v280_v2   ;;  %v276_v50 = vsub.s32 (!%p159_p3), %v273_v47, %v275_v48 }
   0xe   : > { %s532_s12 = smov (!%p191_p4, %s441_s12), 1 }
   0xf   : > { %s393_s20 = sshll.u32 %s532_s12, 3 }
  0x10   : > { %s198_s23 = scalar_lea.vmem %s523_s0, %s393_s20  ;;  %s208_s26 = scalar_lea.vmem %s526_s3, %s393_s20 }
  0x11   : > { %v210_v3 = vld [vmem:[%s198_s23] sm:$0xff] }
  0x12   : > { %v212_v4 = vcombine.high %v210_v3, %v210_v3  ;;  %v215_v5 = vsel %vm214_vm0, %v210_v3, 0.0 }
  0x13   : > { %v216_v7 = vrot.slane %v215_v5, 4 }
  0x14   : > { %v222_v6 = vsel %vm214_vm0, %v212_v4, 0.0 }
  0x15   : > { %v223_v8 = vrot.slane %v222_v6, 4  ;;  %v217_v9 = vadd.f32 %v216_v7, %v215_v5 }
  0x17   : > { %v224_v10 = vadd.f32 %v223_v8, %v222_v6  ;;  %v218_v11 = vrot.slane %v217_v9, 2 }
  0x19   : > { %v225_v12 = vrot.slane %v224_v10, 2  ;;  %v219_v13 = vadd.f32 %v218_v11, %v217_v9 }
  0x1b   : > { %v226_v14 = vadd.f32 %v225_v12, %v224_v10  ;;  %v220_v15 = vrot.slane %v219_v13, 1 }
  0x1d   : > { %v227_v16 = vrot.slane %v226_v14, 1  ;;  %v221_v17 = vadd.f32 %v220_v15, %v219_v13 }
  0x1f   : > { %v228_v18 = vadd.f32 %v227_v16, %v226_v14  ;;  %v230_v19 = vmul.f32 0.25, %v221_v17 }
  0x21   : > { %v231_v20 = vmul.f32 0.25, %v228_v18 }
  0x23   : > { %v234_v21 = vcombine.low %v230_v19, %v231_v20 }
  0x25   : > { %v236_v22 = vsub.f32 %v210_v3, %v234_v21 }
  0x27   : > { %v237_v23 = vmul.f32 %v236_v22, %v236_v22 }
  0x29   : > { %v239_v24 = vcombine.high %v237_v23, %v237_v23  ;;  %v241_v25 = vsel %vm214_vm0, %v237_v23, 0.0 }
  0x2a   : > { %v242_v27 = vrot.slane %v241_v25, 4 }
  0x2b   : > { %v248_v26 = vsel %vm214_vm0, %v239_v24, 0.0 }
  0x2c   : > { %v249_v28 = vrot.slane %v248_v26, 4  ;;  %v243_v29 = vadd.f32 %v242_v27, %v241_v25 }
  0x2e   : > { %v250_v30 = vadd.f32 %v249_v28, %v248_v26  ;;  %v244_v31 = vrot.slane %v243_v29, 2 }
  0x30   : > { %v251_v32 = vrot.slane %v250_v30, 2  ;;  %v245_v33 = vadd.f32 %v244_v31, %v243_v29 }
  0x32   : > { %v252_v34 = vadd.f32 %v251_v32, %v250_v30  ;;  %v246_v35 = vrot.slane %v245_v33, 1 }
  0x34   : > { %v253_v36 = vrot.slane %v252_v34, 1  ;;  %v247_v37 = vadd.f32 %v246_v35, %v245_v33 }
  0x36   : > { %v254_v38 = vadd.f32 %v253_v36, %v252_v34  ;;  %v255_v39 = vmul.f32 0.25, %v247_v37 }
  0x38   : > { %v256_v40 = vmul.f32 0.25, %v254_v38  ;;  %v257_v41 = vadd.f32 1e-06, %v255_v39 }
  0x3a   : > { %v258_v42 = vadd.f32 1e-06, %v256_v40  ;;  %423 = vrsqrt.f32 %v257_v41 }
  0x3c   : > { %425 = vrsqrt.f32 %v258_v42 }
  0x44   : > { %v424_v46 = vpop.eup %423 }
  0x46   : > { %v426_v49 = vpop.eup %425 }
  0x47   : > { %v263_v51 = vcombine.low %v424_v46, %v426_v49 }
  0x49   : > { %v265_v53 = vmul.f32 %v263_v51, %v236_v22 }
  0x87   : > { %v270_v52 = vpop.permute.xlu0 %269 }
  0x88   : > { %v277_v54 = vrot.slane %v270_v52, %v276_v50 }
  0x8a   : > { %v279_v56 = vmul.f32 %v277_v54, %v265_v53 }
  0x8b   : > { %v284_v55 = vpop.permute.xlu0 %283 }
  0x8c   : > { %v291_v57 = vrot.slane %v284_v55, %v276_v50 }
  0x8e   : > { %v293_v58 = vadd.f32 %v291_v57, %v279_v56 }
  0x90   : > { %294 = vst [vmem:[%s208_s26] sm:$0xff] %v293_v58 }
  0x91 PF: > { %s13_s14 = sadd.s32 1, %s449_s14   ;;  %s527_s12 = smov %s445_s13 }
  0x92   : > { %p10_p5 = scmp.ge.s32.totalorder %s13_s14, 4   ;;  %s528_s13 = smov %s530_s15 }
  0x94   :  { %12 = sbr.rel (!%p10_p5) target bundleno = 2 (0x2), region = 62 }

</bundles_post_ra>
